<compile_context>
chip_gen: v6e
topology: v6e:2x2x1
jax: 0.10.0
libtpu: 0.0.40
codegen_flags: <defaults>
</compile_context>

<pallas_src>
import jax
import jax.numpy as jnp
from jax.experimental import pallas as pl
from jax.experimental.pallas import tpu as pltpu


# ----------------------------- Pallas kernel --------------------------------
def _replicator_kernel(x_ref,      # (1, 1, T) f32  abundances, T = TB*N tokens on lanes
                       mask_ref,   # (T, T)   f32  block-diagonal per-batch segment mask
                       freq_ref,   # (F, 1)   f32  learned Fourier frequencies
                       w1sc_ref,   # (H, 2F)  bf16 folded (enc_w @ w1).T, [sin | cos] halves
                       c_ref,      # (H, T)   f32  folded pre-ReLU bias: ((enc_b+emb)@w1+b1).T tiled
                       w2d_ref,    # (1, H)   bf16 folded (w2 * dec_w) row
                       bfit_ref,   # (1, 1)   f32  folded decoder bias (SMEM)
                       gate_ref,   # (1, 1)   f32  gate scalar (Identity => 1.0) (SMEM)
                       out_ref):   # (1, 1, T) f32 dx/dt
    x_row = x_ref[0]                                            # (1, T)

    # ---- AbundanceEncoder_LearnedFourier features (f32 elementwise path) ----
    # TODO(synk): exact torch encoder internals unknown; synthetic learned-Fourier
    # (log -> sin/cos of learned freqs -> Linear) used as the encode path.
    u = jnp.log(x_row + 1e-8)                                   # (1, T)
    z = freq_ref[...] * u                                       # (F, T) broadcast outer product
    sincos = jnp.concatenate([jnp.sin(z), jnp.cos(z)], axis=0)  # (2F, T) sublane stack (free)

    # ---- fused encoder-Linear + embed-add + fitness layer-1 (ReLU), one bf16 MXU dot ----
    h1 = jnp.maximum(
        jnp.dot(w1sc_ref[...], sincos.astype(jnp.bfloat16),
                preferred_element_type=jnp.float32) + c_ref[...],
        0.0)                                                    # (H, T) f32

    # ---- fitness layer-2 folded with Decoder ----
    fit = (jnp.dot(w2d_ref[...], h1.astype(jnp.bfloat16),
                   preferred_element_type=jnp.float32)
           + bfit_ref[0, 0])                                    # (1, T)

    # ---- per-batch xT_fx via block-diag segment mask (single f32 MXU tile) ----
    xfit = x_row * fit                                          # (1, T)
    xT_fx = jnp.dot(xfit, mask_ref[...],
                    preferred_element_type=jnp.float32)         # (1, T) per-batch sums broadcast

    out_ref[0] = (x_row * (fit - xT_fx)) * gate_ref[0, 0]


# ------------------------------- wrapper -------------------------------------
def _batches_per_block(B, N, max_tokens=512):
    """Largest divisor of B whose token block (TB*N lanes) stays <= max_tokens."""
    tb = 1
    for cand in range(1, B + 1):
        if B % cand == 0 and cand * N <= max_tokens:
            tb = cand
    return tb


def replicator_ode_forward(t, x, embeddings, params):
    """x: (B, N) float32, embeddings: (N, D) float32. Returns dxdt (B, N)."""
    del t  # unused, as in the PyTorch module
    B, N = x.shape
    Nn, D = embeddings.shape
    assert Nn == N
    F = params["freq"].shape[-1]
    H = params["w1"].shape[-1]

    TB = _batches_per_block(B, N)        # batches packed per grid step (lane-dense tokens)
    G = B // TB                          # grid length (>=2 batch-blocks shard across v7x TCs)
    T = TB * N                           # tokens per block, on the lane axis

    # ---------------- layout plumbing (one-time, outside the kernel) ----------------
    x3 = x.astype(jnp.float32).reshape(G, 1, T)

    # Fold everything linear before the ReLU (exact algebra, done once in f32):
    enc_w = params["enc_w"].astype(jnp.float32)                         # (2F, D)
    w1 = params["w1"].astype(jnp.float32)                               # (D, H)
    w1sc = (enc_w @ w1).T                                               # (H, 2F)
    c_species = ((params["enc_b"] + embeddings.astype(jnp.float32)) @ w1
                 + params["b1"]).T                                      # (H, N)
    c_tiled = jnp.tile(c_species, (1, TB))                              # (H, T)

    # Fold fitness layer-2 into the decoder:
    w2d = jnp.sum(params["w2"] * params["dec_w"][0][None, :], axis=1).reshape(1, H)
    b_fit = (jnp.sum(params["b2"][0] * params["dec_w"][0])
             + params["dec_b"][0, 0]).reshape(1, 1)

    gate = params.get("gate", jnp.ones((1, 1), jnp.float32)).reshape(1, 1)
    freq_col = params["freq"].reshape(F, 1).astype(jnp.float32)

    # Block-diagonal segment mask for per-batch xT_fx (same for every batch-block).
    seg = jnp.repeat(jnp.arange(TB, dtype=jnp.int32), N)
    mask = (seg[:, None] == seg[None, :]).astype(jnp.float32)           # (T, T)

    # bf16 operands for the MXU dots (accumulation stays f32).
    w1sc_bf = w1sc.astype(jnp.bfloat16)
    w2d_bf = w2d.astype(jnp.bfloat16)

    const = lambda g: (0, 0)
    in_specs = [
        pl.BlockSpec((1, 1, T), lambda g: (g, 0, 0)),            # x slab
        pl.BlockSpec((T, T), const),                             # segment mask
        pl.BlockSpec((F, 1), const),                             # learned freqs
        pl.BlockSpec((H, 2 * F), const),                         # folded enc+w1 weight (bf16)
        pl.BlockSpec((H, T), const),                             # folded pre-ReLU bias (+emb)
        pl.BlockSpec((1, H), const),                             # folded w2*dec_w (bf16)
        pl.BlockSpec(memory_space=pltpu.MemorySpace.SMEM),       # folded decoder bias scalar
        pl.BlockSpec(memory_space=pltpu.MemorySpace.SMEM),       # gate scalar
    ]

    flops = int(B * N * (2 * H * 2 * F + 2 * H + 2 * T + 8))
    transcendentals = int(B * N * (2 * F + 1))
    bytes_accessed = int(4 * (2 * B * N + T * T + F + H * T + H + 2)
                         + 2 * (H * 2 * F + H))

    out = pl.pallas_call(
        _replicator_kernel,
        out_shape=jax.ShapeDtypeStruct((G, 1, T), jnp.float32),
        grid=(G,),
        in_specs=in_specs,
        out_specs=pl.BlockSpec((1, 1, T), lambda g: (g, 0, 0)),
        compiler_params=pltpu.CompilerParams(
            dimension_semantics=("parallel",),
            vmem_limit_bytes=32 * 1024 * 1024),
        cost_estimate=pl.CostEstimate(
            flops=flops,
            transcendentals=transcendentals,
            bytes_accessed=bytes_accessed),
    )(x3, mask, freq_col, w1sc_bf, c_tiled, w2d_bf, b_fit, gate)

    return out.reshape(B, N)


# --------------------------- pure-JAX reference -------------------------------
def replicator_ode_reference(t, x, embeddings, params):
    del t
    u = jnp.log(x + 1e-8)[..., None]                                  # (B, N, 1)
    z = u * params["freq"][0]                                         # (B, N, F)
    feats = jnp.concatenate([jnp.sin(z), jnp.cos(z)], axis=-1)        # (B, N, 2F)
    enc = feats @ params["enc_w"] + params["enc_b"][0]
    h = enc + embeddings[None]
    h1 = jax.nn.relu(h @ params["w1"] + params["b1"][0])
    h2 = h1 @ params["w2"] + params["b2"][0]
    fit = jnp.sum(h2 * params["dec_w"][0], axis=-1) + params["dec_b"][0, 0]  # (B, N)
    xT_fx = jnp.sum(x * fit, axis=-1, keepdims=True)
    return x * (fit - xT_fx) * params["gate"][0, 0]


# ------------------------------ parameters ------------------------------------
def make_params(key, embed_dim, hidden_dim):
    D, H, F = embed_dim, hidden_dim, embed_dim // 2
    ks = jax.random.split(key, 8)
    s = 0.1
    return {
        "freq":  jax.random.normal(ks[0], (1, F), jnp.float32) * 2.0,
        "enc_w": jax.random.normal(ks[1], (D, D), jnp.float32) * s,
        "enc_b": jax.random.normal(ks[2], (1, D), jnp.float32) * s,
        "w1":    jax.random.normal(ks[3], (D, H), jnp.float32) * s,
        "b1":    jax.random.normal(ks[4], (1, H), jnp.float32) * s,
        "w2":    jax.random.normal(ks[5], (H, D), jnp.float32) * s,
        "b2":    jax.random.normal(ks[6], (1, D), jnp.float32) * s,
        "dec_w": jax.random.normal(ks[7], (1, D), jnp.float32) * s,
        "dec_b": jnp.zeros((1, 1), jnp.float32),
        # learnable_skip=False -> nn.Identity, represented by a unit gate scalar
        "gate":  jnp.ones((1, 1), jnp.float32),
    }


# --------------------------------- main ---------------------------------------
if __name__ == "__main__":
    # batch, n_species, embed_dim, hidden_dim (B*N = 128 -> lane-dense token slab)
    B, N, D, H = 8, 16, 32, 64

    key = jax.random.PRNGKey(0)
    k_x, k_e, k_p = jax.random.split(key, 3)

    # abundances: positive, sum to 1 per batch (simplex), as in a replicator model
    x = jax.nn.softmax(jax.random.normal(k_x, (B, N), jnp.float32), axis=-1)
    embeddings = jax.random.normal(k_e, (N, D), jnp.float32) * 0.1
    params = make_params(k_p, D, H)

    t = jnp.float32(0.0)
    dxdt = replicator_ode_forward(t, x, embeddings, params)
    dxdt = jax.block_until_ready(dxdt)

    ref = replicator_ode_reference(t, x, embeddings, params)
    assert dxdt.shape == (B, N)
    # bf16 MXU operands -> loosened tolerance (per perf review); folds are exact algebra.
    assert jnp.allclose(dxdt, ref, atol=3e-3, rtol=3e-2), "mismatch vs reference"

    print("KERNEL_OK")
</pallas_src>

<mosaic_0001>
module attributes {stable_mosaic.version = 11 : i64} {
  func.func @_replicator_kernel(%arg0: i32, %arg1: memref<1x1x128xf32, #tpu.memory_space<vmem>>, %arg2: memref<128x128xf32, #tpu.memory_space<vmem>>, %arg3: memref<16x1xf32, #tpu.memory_space<vmem>>, %arg4: memref<64x32xbf16, #tpu.memory_space<vmem>>, %arg5: memref<64x128xf32, #tpu.memory_space<vmem>>, %arg6: memref<1x64xbf16, #tpu.memory_space<vmem>>, %arg7: memref<1x1xf32, #tpu.memory_space<smem>>, %arg8: memref<1x1xf32, #tpu.memory_space<smem>>, %arg9: memref<1x1x128xf32, #tpu.memory_space<vmem>>) attributes {dimension_semantics = [#tpu.dimension_semantics<parallel>], iteration_bounds = array<i64: 1>, scalar_prefetch = 0 : i64, scratch_operands = 0 : i64, tpu.core_type = #tpu.core_type<tc>, window_params = [{transform_indices = @transform_0, window_bounds = array<i64: 1, 1, 128>}, {pipeline_mode = #tpu.pipeline_mode<synchronous>, transform_indices = @transform_1, window_bounds = array<i64: 128, 128>}, {pipeline_mode = #tpu.pipeline_mode<synchronous>, transform_indices = @transform_2, window_bounds = array<i64: 16, 1>}, {pipeline_mode = #tpu.pipeline_mode<synchronous>, transform_indices = @transform_3, window_bounds = array<i64: 64, 32>}, {pipeline_mode = #tpu.pipeline_mode<synchronous>, transform_indices = @transform_4, window_bounds = array<i64: 64, 128>}, {pipeline_mode = #tpu.pipeline_mode<synchronous>, transform_indices = @transform_5, window_bounds = array<i64: 1, 64>}, {transform_indices = @transform_6, window_bounds = array<i64: 1, 1>}, {transform_indices = @transform_7, window_bounds = array<i64: 1, 1>}, {transform_indices = @transform_8, window_bounds = array<i64: 1, 1, 128>}]} {
    %c0 = arith.constant 0 : index
    %c0_0 = arith.constant 0 : index
    %c0_1 = arith.constant 0 : index
    %0 = vector.load %arg1[%c0, %c0_0, %c0_1] : memref<1x1x128xf32, #tpu.memory_space<vmem>>, vector<1x1x128xf32>
    %1 = vector.shape_cast %0 : vector<1x1x128xf32> to vector<1x128xf32>
    %cst = arith.constant 9.99999993E-9 : f32
    %2 = vector.broadcast %cst : f32 to vector<1x128xf32>
    %3 = arith.addf %1, %2 : vector<1x128xf32>
    %4 = math.log %3 : vector<1x128xf32>
    %c0_2 = arith.constant 0 : index
    %c0_3 = arith.constant 0 : index
    %5 = vector.load %arg3[%c0_2, %c0_3] : memref<16x1xf32, #tpu.memory_space<vmem>>, vector<16x1xf32>
    %6 = vector.broadcast %5 : vector<16x1xf32> to vector<16x128xf32>
    %7 = vector.broadcast %4 : vector<1x128xf32> to vector<16x128xf32>
    %8 = arith.mulf %6, %7 : vector<16x128xf32>
    %9 = math.sin %8 : vector<16x128xf32>
    %10 = math.cos %8 : vector<16x128xf32>
    %11 = tpu.concatenate %9, %10 in 0 : vector<16x128xf32>, vector<16x128xf32> -> vector<32x128xf32>
    %c0_4 = arith.constant 0 : index
    %c0_5 = arith.constant 0 : index
    %12 = vector.load %arg4[%c0_4, %c0_5] : memref<64x32xbf16, #tpu.memory_space<vmem>>, vector<64x32xbf16>
    %13 = arith.truncf %11 : vector<32x128xf32> to vector<32x128xbf16>
    %cst_6 = arith.constant dense<0.000000e+00> : vector<64x128xf32>
    %14 = tpu.matmul %12, %13, %cst_6 {dimension_numbers = #tpu.dot_dimension_numbers<[1], [0], [0], [1], [0, 0, 1, 1], [], []>} : vector<64x32xbf16>, vector<32x128xbf16>, vector<64x128xf32> -> vector<64x128xf32>
    %c0_7 = arith.constant 0 : index
    %c0_8 = arith.constant 0 : index
    %15 = vector.load %arg5[%c0_7, %c0_8] : memref<64x128xf32, #tpu.memory_space<vmem>>, vector<64x128xf32>
    %16 = arith.addf %14, %15 : vector<64x128xf32>
    %cst_9 = arith.constant 0.000000e+00 : f32
    %17 = vector.broadcast %cst_9 : f32 to vector<64x128xf32>
    %18 = arith.maximumf %16, %17 : vector<64x128xf32>
    %c0_10 = arith.constant 0 : index
    %c0_11 = arith.constant 0 : index
    %19 = vector.load %arg6[%c0_10, %c0_11] : memref<1x64xbf16, #tpu.memory_space<vmem>>, vector<1x64xbf16>
    %20 = arith.truncf %18 : vector<64x128xf32> to vector<64x128xbf16>
    %cst_12 = arith.constant dense<0.000000e+00> : vector<1x128xf32>
    %21 = tpu.matmul %19, %20, %cst_12 {dimension_numbers = #tpu.dot_dimension_numbers<[1], [0], [0], [1], [0, 0, 1, 1], [], []>} : vector<1x64xbf16>, vector<64x128xbf16>, vector<1x128xf32> -> vector<1x128xf32>
    %c0_13 = arith.constant 0 : index
    %c0_14 = arith.constant 0 : index
    %22 = memref.load %arg7[%c0_13, %c0_14] : memref<1x1xf32, #tpu.memory_space<smem>>
    %23 = vector.broadcast %22 : f32 to vector<1x128xf32>
    %24 = arith.addf %21, %23 : vector<1x128xf32>
    %25 = arith.mulf %1, %24 : vector<1x128xf32>
    %c0_15 = arith.constant 0 : index
    %c0_16 = arith.constant 0 : index
    %26 = vector.load %arg2[%c0_15, %c0_16] : memref<128x128xf32, #tpu.memory_space<vmem>>, vector<128x128xf32>
    %cst_17 = arith.constant dense<0.000000e+00> : vector<1x128xf32>
    %27 = tpu.matmul %25, %26, %cst_17 {dimension_numbers = #tpu.dot_dimension_numbers<[1], [0], [0], [1], [0, 0, 1, 1], [], []>} : vector<1x128xf32>, vector<128x128xf32>, vector<1x128xf32> -> vector<1x128xf32>
    %28 = arith.subf %24, %27 : vector<1x128xf32>
    %29 = arith.mulf %1, %28 : vector<1x128xf32>
    %c0_18 = arith.constant 0 : index
    %c0_19 = arith.constant 0 : index
    %30 = memref.load %arg8[%c0_18, %c0_19] : memref<1x1xf32, #tpu.memory_space<smem>>
    %31 = vector.broadcast %30 : f32 to vector<1x128xf32>
    %32 = arith.mulf %29, %31 : vector<1x128xf32>
    %c0_20 = arith.constant 0 : index
    %c0_21 = arith.constant 0 : index
    %c0_22 = arith.constant 0 : index
    %33 = vector.load %arg9[%c0_20, %c0_21, %c0_22] : memref<1x1x128xf32, #tpu.memory_space<vmem>>, vector<1x1x128xf32>
    %34 = vector.shape_cast %33 : vector<1x1x128xf32> to vector<1x128xf32>
    %35 = vector.shape_cast %32 : vector<1x128xf32> to vector<1x1x128xf32>
    tpu.vector_store %arg9[%c0_20, %c0_21, %c0_22], %35 {strides = array<i32>} : memref<1x1x128xf32, #tpu.memory_space<vmem>>, vector<1x1x128xf32>,
    return
  }
  func.func @transform_0(%arg0: i32) -> (i32, i32, i32) {
    %c0_i32 = arith.constant 0 : i32
    %c0_i32_0 = arith.constant 0 : i32
    %c0_i32_1 = arith.constant 0 : i32
    return %arg0, %c0_i32, %c0_i32_0 : i32, i32, i32
  }
  func.func @transform_1(%arg0: i32) -> (i32, i32) {
    %c0_i32 = arith.constant 0 : i32
    %c0_i32_0 = arith.constant 0 : i32
    %c0_i32_1 = arith.constant 0 : i32
    return %c0_i32, %c0_i32_0 : i32, i32
  }
  func.func @transform_2(%arg0: i32) -> (i32, i32) {
    %c0_i32 = arith.constant 0 : i32
    %c0_i32_0 = arith.constant 0 : i32
    %c0_i32_1 = arith.constant 0 : i32
    return %c0_i32, %c0_i32_0 : i32, i32
  }
  func.func @transform_3(%arg0: i32) -> (i32, i32) {
    %c0_i32 = arith.constant 0 : i32
    %c0_i32_0 = arith.constant 0 : i32
    %c0_i32_1 = arith.constant 0 : i32
    return %c0_i32, %c0_i32_0 : i32, i32
  }
  func.func @transform_4(%arg0: i32) -> (i32, i32) {
    %c0_i32 = arith.constant 0 : i32
    %c0_i32_0 = arith.constant 0 : i32
    %c0_i32_1 = arith.constant 0 : i32
    return %c0_i32, %c0_i32_0 : i32, i32
  }
  func.func @transform_5(%arg0: i32) -> (i32, i32) {
    %c0_i32 = arith.constant 0 : i32
    %c0_i32_0 = arith.constant 0 : i32
    %c0_i32_1 = arith.constant 0 : i32
    return %c0_i32, %c0_i32_0 : i32, i32
  }
  func.func @transform_6(%arg0: i32) -> (i32, i32) {
    %c0_i32 = arith.constant 0 : i32
    %c0_i32_0 = arith.constant 0 : i32
    %c0_i32_1 = arith.constant 0 : i32
    return %c0_i32, %c0_i32_0 : i32, i32
  }
  func.func @transform_7(%arg0: i32) -> (i32, i32) {
    %c0_i32 = arith.constant 0 : i32
    %c0_i32_0 = arith.constant 0 : i32
    %c0_i32_1 = arith.constant 0 : i32
    return %c0_i32, %c0_i32_0 : i32, i32
  }
  func.func @transform_8(%arg0: i32) -> (i32, i32, i32) {
    %c0_i32 = arith.constant 0 : i32
    %c0_i32_0 = arith.constant 0 : i32
    %c0_i32_1 = arith.constant 0 : i32
    return %arg0, %c0_i32, %c0_i32_0 : i32, i32, i32
  }
}

</mosaic_0001>

<bundles_post_ra>
// kernel: tpu_custom_call.1
= control target key start
LH: loop header
LB: loop body
LE: loop exit
PB: predicated region body
PF: predicated region fallthrough
CT: control target
= control target key end

     0   :  { %15 = vsyncpa [#allocation5], 0  ;;  %s1192_s0 = inlined_call_operand.vmem [shape: f32[1,1,128], index: 0, kind: input, shape index: {}]   ;;  %s1193_s1 = inlined_call_operand.hbm [shape: f32[128,128], index: 1, kind: input, shape index: {}]   ;;  %s1194_s2 = inlined_call_operand.vmem [shape: f32[16,1], index: 2, kind: input, shape index: {}]   ;;  %s1195_s3 = inlined_call_operand.vmem [shape: bf16[64,32], index: 3, kind: input, shape index: {}]   ;;  %s1196_s4 = inlined_call_operand.vmem [shape: f32[64,128], index: 4, kind: input, shape index: {}]   ;;  %s1197_s5 = inlined_call_operand.vmem [shape: bf16[1,64], index: 5, kind: input, shape index: {}]   ;;  %s1198_s6 = inlined_call_operand.<no memory space> [shape: f32[1,1], index: 6, kind: input, shape index: {}]   ;;  %s1199_s7 = inlined_call_operand.<no memory space> [shape: f32[1,1], index: 7, kind: input, shape index: {}]   ;;  %s1200_s8 = inlined_call_operand.hbm [shape: f32[1,1,128], index: 8, kind: output, shape index: {}]  }
   0x1   :  { %16 = vsyncpa [#allocation6], 0  ;;  %s960_s27 = smov [#allocation4]  }
   0x2   :  { %s24_s28 = sshll.u32 %s960_s27, 4  ;;  %s25_s28 = int_to_ptr.vmem [resolvable:$true] %s24_s28 }
   0x3   :  { %s924_s29 = scalar_lea.vmem %s25_s28, 2048  ;;  %p929_p1 = scmp.lt.s32.totalorder %s25_s28, %s25_s28 }
   0x4   :  { %p925_p0 = scmp.ne.s32.totalorder %s25_s28, %s924_s29  ;;  %p930_p2 = scmp.lt.s32.totalorder %s924_s29, %s924_s29 }
   0x6   :  { %p931_p3 = por %p930_p2, %p929_p1 }
   0x8   :  { %p932_p4 = pnand %p931_p3, %p925_p0 }
   0xa   :  { %935 = shalt.err (!%p932_p4)
}
   0xb   :  { %s961_s30 = smov 128   ;;  %s962_s9 = smov 8  }
   0xc   :  { %30 = dma.hbm_to_vmem [thread:$0]  %s1193_s1, 2048, %s25_s28, [#allocation5], %s961_s30, %s961_s30, %s962_s9  }
   0xd   :  { %956 = dma.done.wait [#allocation5], 2048  }
   0xe   :  { %957 = vsyncadd [#allocation5], 4294965248  ;;  %v963_v0 = vmov 0   ;;  %v51_v1 = vld [vmem:[%s1194_s2] sm:$0xff]  ;;  %v52_v2 = vld [vmem:[%s1194_s2 + $0x8] sm:$0xff]  ;;  %vm523_vm0 = vcmask 261120   ;;  %v64_v6 = vlaneseq }
   0xf   :  { %901 = vset.pattern.permute.xlu0 %v963_v0  ;;  %v1030_v3 = vld [vmem:[%s1192_s0] sm:$0x1]  ;;  %v964_v32 = vmov 683565275   ;;  %v965_v36 = vmov 2475754826  }
  0x10   :  { %55 = vperm.xlu0 %901, %v51_v1   ;;  %v48_v4 = vadd.f32 1e-08, %v1030_v3  ;;  %v902_v5 = vld [vmem:[%s1195_s3] sm:$0xff]   ;;  %v65_v7 = vshrl.u32 %v64_v6, 7  ;;  %v966_v38 = vmov 2131351028  }
  0x11   :  { %825 = vmatprep.mubr.msk.bf16.mxu1 %vm523_vm0, %v902_v5  ;;  %v967_v40 = vmov 2102212464   ;;  %v968_v42 = vmov 920167782   ;;  %v969_v49 = vmov 1326507024  }
  0x12   :  { %906 = vlog2.f32 %v48_v4  ;;  %v66_v9 = vsub.s32 0, %v65_v7  ;;  %s972_s0 = smov [#allocation7]  }
  0x13   :  { %s759_s2 = sshll.u32 %s972_s0, 4  ;;  %s760_s2 = int_to_ptr.vmem [resolvable:$true] %s759_s2 }
  0x14   :  { %60 = vperm.xlu0 %901, %v52_v2   ;;  %s940_s19 = scalar_lea.vmem %s760_s2, 32  ;;  %p941_p6 = scmp.lt.s32.totalorder %s760_s2, %s760_s2 }
  0x1f   :  { %v907_v8 = vpop.eup %906 }
  0x20   :  { %v50_v10 = vmul.f32 0.6931472, %v907_v8 }
  0x22   :  { %v67_v11 = vrot.slane %v50_v10, %v66_v9 }
  0x8b   :  { %v56_v12 = vpop.permute.xlu0 %55 }
  0x8c   :  { %v1037_v13 = vmul.f32 %v67_v11, %v56_v12 }
  0x8e   :  { %v71_v14 = vand.u32 2147483647, %v1037_v13  ;;  %v74_v15 = vand.u32 2139095040, %v1037_v13  ;;  %vm73_vm15 = vcmp.lt.s32.totalorder %v1037_v13, 0 }
  0x8f   :  { %v61_v16 = vpop.permute.xlu0 %60 }
  0x90   :  { %v75_v17 = vshrl.u32 %v74_v15, 23  ;;  %v1041_v18 = vmul.f32 %v67_v11, %v61_v16  ;;  %v78_v19 = vand.u32 8388607, %v71_v14 }
  0x92   :  { %v768_v20 = vadd.s32 4294967169, %v75_v17  ;;  %v178_v21 = vand.u32 2139095040, %v1041_v18  ;;  %v79_v23 = vor.u32 8388608, %v78_v19  ;;  %v175_v25 = vand.u32 2147483647, %v1041_v18 }
  0x94   :  { %v81_v22 = vadd.s32 1, %v768_v20  ;;  %v179_v24 = vshrl.u32 %v178_v21, 23  ;;  %v1047_v30 = vshll.u32 %v79_v23, 8  ;;  %v182_v34 = vand.u32 8388607, %v175_v25 }
  0x96   :  { %vm82_vm1 = vcmp.gt.s32.totalorder %v81_v22, 0  ;;  %v772_v27 = vadd.s32 4294967169, %v179_v24  ;;  %v183_v0 = vor.u32 8388608, %v182_v34 }
  0x97   :  { %v83_v26 = vsel %vm82_vm1, %v81_v22, 0  ;;  %vm1095_vm1 = vcmp.le.f32.partialorder %v71_v14, 0.7853982 }
  0x98   :  { %v84_v28 = vshrl.u32 %v83_v26, 5  ;;  %v85_v29 = vand.u32 31, %v83_v26  ;;  %v185_v35 = vadd.s32 1, %v772_v27  ;;  %v223_v16 = vshll.u32 %v183_v0, 8 }
  0x9a   :  { %v86_v31 = vsub.s32 32, %v85_v29  ;;  %v88_v33 = vshll.u32 %v964_v32, %v85_v29  ;;  %v91_v37 = vshll.u32 %v965_v36, %v85_v29  ;;  %v94_v39 = vshll.u32 %v966_v38, %v85_v29 }
  0x9b   :  { %v97_v41 = vshll.u32 %v967_v40, %v85_v29  ;;  %v100_v43 = vshll.u32 %v968_v42, %v85_v29  ;;  %vm103_vm2 = vcmp.lt.s32.totalorder %v84_v28, 1  ;;  %vm105_vm3 = vcmp.lt.s32.totalorder %v84_v28, 3 }
  0x9c   :  { %v89_v44 = vshrl.u32 %v965_v36, %v86_v31  ;;  %v92_v45 = vshrl.u32 %v966_v38, %v86_v31  ;;  %v95_v46 = vshrl.u32 %v967_v40, %v86_v31  ;;  %v87_v47 = vshrl.u32 %v964_v32, %v86_v31 }
  0x9d   :  { %v98_v48 = vshrl.u32 %v968_v42, %v86_v31  ;;  %v101_v50 = vshrl.u32 %v969_v49, %v86_v31  ;;  %vm186_vm4 = vcmp.gt.s32.totalorder %v185_v35, 0  ;;  %vm106_vm5 = vcmp.lt.s32.totalorder %v84_v28, 4 }
  0x9e   :  { %v90_v51 = vor.u32 %v89_v44, %v88_v33  ;;  %v93_v52 = vor.u32 %v92_v45, %v91_v37  ;;  %v96_v53 = vor.u32 %v95_v46, %v94_v39  ;;  %v187_v56 = vsel %vm186_vm4, %v185_v35, 0 }
  0x9f   :  { %v99_v54 = vor.u32 %v98_v48, %v97_v41  ;;  %v102_v55 = vor.u32 %v101_v50, %v100_v43  ;;  %vm104_vm6 = vcmp.lt.s32.totalorder %v84_v28, 2  ;;  %v189_v4 = vand.u32 31, %v187_v56 }
  0xa0   :  { %v107_v57 = vsel %vm103_vm2, %v87_v47, %v90_v51  ;;  %v108_v58 = vsel %vm106_vm5, %v96_v53, 2102212464  ;;  %v111_v59 = vsel %vm103_vm2, %v90_v51, %v93_v52  ;;  %v115_v60 = vsel %vm103_vm2, %v93_v52, %v96_v53 }
  0xa1   :  { %v109_v61 = vsel %vm105_vm3, %v93_v52, %v108_v58  ;;  %v112_v62 = vsel %vm106_vm5, %v99_v54, 920167782  ;;  %v116_v63 = vsel %vm106_vm5, %v102_v55, 1326507024  ;;  %v188_v12 = vshrl.u32 %v187_v56, 5 }
  0xa2   :  { %v113_v1 = vsel %vm105_vm3, %v96_v53, %v112_v62  ;;  %v117_v2 = vsel %vm105_vm3, %v99_v54, %v116_v63  ;;  %v110_v5 = vsel %vm104_vm6, %v107_v57, %v109_v61  ;;  %v190_v15 = vsub.s32 32, %v189_v4 }
  0xa3   :  { %v114_v6 = vsel %vm104_vm6, %v111_v59, %v113_v1  ;;  %v118_v7 = vsel %vm104_vm6, %v115_v60, %v117_v2  ;;  %v126_v17 = vmul.u32 %v1047_v30, %v110_v5  ;;  %v192_v19 = vshll.u32 %v964_v32, %v189_v4 }
  0xa4   :  { %v1060_v8 = vmul.u32.u64.low %v1047_v30, %v118_v7  ;;  %v1061_v9 = vmul.u32.u64.high %v1047_v30, %v118_v7, %v1060_v8  ;;  %v1064_v10 = vmul.u32.u64.low %v1047_v30, %v114_v6  ;;  %v1065_v11 = vmul.u32.u64.high %v1047_v30, %v114_v6, %v1064_v10 }
  0xa5   :  { %v195_v20 = vshll.u32 %v965_v36, %v189_v4  ;;  %v198_v21 = vshll.u32 %v966_v38, %v189_v4  ;;  %v193_v22 = vshrl.u32 %v965_v36, %v190_v15  ;;  %v196_v23 = vshrl.u32 %v966_v38, %v190_v15 }
  0xa6   :  { %v199_v24 = vshrl.u32 %v967_v40, %v190_v15  ;;  %v201_v26 = vshll.u32 %v967_v40, %v189_v4  ;;  %vm128_vm7 = vc.u32 %v1061_v9, %v1064_v10  ;;  %v129_v27 = vadd.s32 1, %v1065_v11 }
  0xa7   :  { %v202_v28 = vshrl.u32 %v968_v42, %v190_v15  ;;  %v204_v29 = vshll.u32 %v968_v42, %v189_v4  ;;  %v194_v31 = vor.u32 %v193_v22, %v192_v19  ;;  %v197_v33 = vor.u32 %v196_v23, %v195_v20 }
  0xa8   :  { %v200_v34 = vor.u32 %v199_v24, %v198_v21  ;;  %v205_v35 = vshrl.u32 %v969_v49, %v190_v15  ;;  %v130_v30 = vsel %vm128_vm7, %v129_v27, %v1065_v11  ;;  %vm207_vm8 = vcmp.lt.s32.totalorder %v188_v12, 1 }
  0xa9   :  { %v203_v37 = vor.u32 %v202_v28, %v201_v26  ;;  %vm210_vm9 = vcmp.lt.s32.totalorder %v188_v12, 4  ;;  %v131_v36 = vadd.s32 %v130_v30, %v126_v17  ;;  %vm209_vm10 = vcmp.lt.s32.totalorder %v188_v12, 3 }
  0xaa   :  { %v206_v38 = vor.u32 %v205_v35, %v204_v29  ;;  %v212_v39 = vsel %vm210_vm9, %v200_v34, 2102212464  ;;  %v191_v40 = vshrl.u32 %v964_v32, %v190_v15  ;;  %v215_v41 = vsel %vm207_vm8, %v194_v31, %v197_v33 }
  0xab   :  { %v216_v43 = vsel %vm210_vm9, %v203_v37, 920167782  ;;  %v219_v44 = vsel %vm207_vm8, %v197_v33, %v200_v34  ;;  %v132_v45 = vadd.s32 536870912, %v131_v36  ;;  %vm208_vm11 = vcmp.lt.s32.totalorder %v188_v12, 2 }
  0xac   :  { %v217_v42 = vsel %vm209_vm10, %v200_v34, %v216_v43  ;;  %v220_v46 = vsel %vm210_vm9, %v206_v38, 1326507024  ;;  %v211_v47 = vsel %vm207_vm8, %v191_v40, %v194_v31  ;;  %v213_v48 = vsel %vm209_vm10, %v197_v33, %v212_v39 }
  0xad   :  { %v218_v49 = vsel %vm208_vm11, %v215_v41, %v217_v42  ;;  %v221_v50 = vsel %vm209_vm10, %v203_v37, %v220_v46  ;;  %v1075_v51 = vshrl.u32 %v132_v45, 30  ;;  %v214_v57 = vsel %vm208_vm11, %v211_v47, %v213_v48  ;;  %v664_v41 = vld [vmem:[#allocation4 + $0x18] sm:$0xff] }
  0xae   :  { %v222_v52 = vsel %vm208_vm11, %v219_v44, %v221_v50  ;;  %v1077_v53 = vmul.u32.u64.low %v223_v16, %v218_v49  ;;  %v1078_v54 = vmul.u32.u64.high %v223_v16, %v218_v49, %v1077_v53  ;;  %v230_v60 = vmul.u32 %v223_v16, %v214_v57 }
  0xaf   :  { %v1080_v55 = vmul.u32.u64.low %v223_v16, %v222_v52  ;;  %v1081_v56 = vmul.u32.u64.high %v223_v16, %v222_v52, %v1080_v55  ;;  %v134_v32 = vshll.u32 %v1075_v51, 30  ;;  %v127_v11 = vadd.s32 %v1064_v10, %v1061_v9 }
  0xb0   :  { %v233_v59 = vadd.s32 1, %v1078_v54  ;;  %v157_v47 = vsub.s32 4, %v1075_v51  ;;  %vm177_vm2 = vcmp.lt.s32.totalorder %v1041_v18, 0  ;;  %vm176_vm3 = vcmp.le.f32.partialorder %v175_v25, 0.7853982 }
  0xb1   :  { %v135_v58 = vsub.s32 %v131_v36, %v134_v32  ;;  %vm232_vm12 = vc.u32 %v1081_v56, %v1077_v53  ;;  %v231_v34 = vadd.s32 %v1077_v53, %v1081_v56  ;;  %vm163_vm4 = vweird.f32 %v1037_v13 }
  0xb2   :  { %v234_v62 = vsel %vm232_vm12, %v233_v59, %v1078_v54  ;;  %v158_v50 = vsel %vm73_vm15, %v157_v47, %v1075_v51 }
  0xb3   :  { %v137_v61 = vsub.s32 0, %v135_v58  ;;  %v235_v63 = vadd.s32 %v234_v62, %v230_v60  ;;  %v160_v54 = vsel %vm1095_vm1, 0, %v158_v50  ;;  %v499_v50 = vld [vmem:[%s1196_s4 + $0x20] sm:$0xff] }
  0xb4   :  { %v164_v32 = vadd.s32 3, %v160_v54  ;;  %v372_v59 = vand.u32 3, %v160_v54 }
  0xb5   :  { %v769_v0 = vmin.u32 %v137_v61, %v135_v58  ;;  %v236_v1 = vadd.s32 536870912, %v235_v63 }
  0xb6   :  { %v165_v60 = vand.u32 3, %v164_v32  ;;  %vm373_vm5 = vcmp.lt.s32.totalorder %v372_v59, 2  ;;  %vm374_vm6 = vcmp.eq.s32.totalorder %v372_v59, 0  ;;  %vm377_vm7 = vcmp.eq.s32.totalorder %v372_v59, 2 }
  0xb7   :  { %v139_v2 = vclz %v769_v0  ;;  %v237_v4 = vshrl.u32 %v236_v1, 30 }
  0xb8   :  { %vm166_vm8 = vcmp.lt.s32.totalorder %v165_v60, 2  ;;  %vm167_vm9 = vcmp.eq.s32.totalorder %v165_v60, 0  ;;  %vm170_vm10 = vcmp.eq.s32.totalorder %v165_v60, 2  ;;  %v497_v60 = vld [vmem:[%s1196_s4 + $0x10] sm:$0xff] }
  0xb9   :  { %v770_v5 = vadd.s32 4294967294, %v139_v2  ;;  %v238_v6 = vshll.u32 %v237_v4, 30  ;;  %v261_v49 = vsub.s32 4, %v237_v4 }
  0xbb   :  { %vm771_vm13 = vcmp.lt.s32.totalorder %v770_v5, 0  ;;  %v239_v8 = vsub.s32 %v235_v63, %v238_v6  ;;  %v262_v53 = vsel %vm177_vm2, %v261_v49, %v237_v4  ;;  %v502_v49 = vld [vmem:[%s1196_s4 + $0x38] sm:$0xff] }
  0xbc   :  { %v142_v7 = vsel %vm771_vm13, 0, %v770_v5  ;;  %v264_v55 = vsel %vm176_vm3, 0, %v262_v53  ;;  %v500_v53 = vld [vmem:[%s1196_s4 + $0x28] sm:$0xff] }
  0xbd   :  { %v143_v12 = vsub.s32 32, %v142_v7  ;;  %v147_v15 = vsub.s32 4294967266, %v142_v7  ;;  %v241_v16 = vsub.s32 0, %v239_v8  ;;  %v144_v17 = vshll.u32 %v135_v58, %v142_v7 }
  0xbe   :  { %v268_v58 = vadd.s32 3, %v264_v55  ;;  %v475_v62 = vand.u32 3, %v264_v55  ;;  %v498_v55 = vld [vmem:[%s1196_s4 + $0x18] sm:$0xff] }
  0xbf   :  { %v145_v19 = vshrl.u32 %v127_v11, %v143_v12  ;;  %v148_v20 = vadd.s32 127, %v147_v15  ;;  %v773_v21 = vmin.u32 %v241_v16, %v239_v8 }
  0xc0   :  { %v269_v63 = vand.u32 3, %v268_v58  ;;  %vm477_vm11 = vcmp.eq.s32.totalorder %v475_v62, 0  ;;  %vm480_vm12 = vcmp.eq.s32.totalorder %v475_v62, 2 }
  0xc1   :  { %v146_v22 = vor.u32 %v145_v19, %v144_v17  ;;  %v149_v23 = vshll.u32 %v148_v20, 23  ;;  %v243_v24 = vclz %v773_v21 }
  0xc2   :  { %vm274_vm13 = vcmp.eq.s32.totalorder %v269_v63, 2 }
  0xc3   :  { %v150_v26 = vor.u32 4788187, %v149_v23  ;;  %v774_v27 = vadd.s32 4294967294, %v243_v24  ;;  %v153_v29 = vcvt.s32.f32 %v146_v22 }
  0xc5   :  { %v151_v28 = vand.u32 2147483647, %v150_v26  ;;  %vm775_vm14 = vcmp.lt.s32.totalorder %v774_v27, 0 }
  0xc6   :  { %v246_v33 = vsel %vm775_vm14, 0, %v774_v27  ;;  %vm271_vm14 = vcmp.eq.s32.totalorder %v269_v63, 0 }
  0xc7   :  { %v154_v31 = vmul.f32 %v153_v29, %v151_v28  ;;  %v247_v9 = vsub.s32 32, %v246_v33  ;;  %v251_v10 = vsub.s32 4294967266, %v246_v33  ;;  %v248_v30 = vshll.u32 %v239_v8, %v246_v33  ;;  %v903_v28 = vld [vmem:[%s1195_s3 + $0x8] sm:$0xff]   ;;  %v675_v33 = vld [vmem:[#allocation4 + $0x70] sm:$0xff] }
  0xc8   :  { %v970_v29 = vmov 0.0  }
  0xc9   :  { %v155_v35 = vxor.u32 2147483648, %v154_v31  ;;  %v249_v37 = vshrl.u32 %v231_v34, %v247_v9  ;;  %v252_v36 = vadd.s32 127, %v251_v10  ;;  %845 = vmatprep.subr.mxu0 %v970_v29  ;;  %v674_v34 = vld [vmem:[#allocation4 + $0x68] sm:$0xff]  ;;  %v673_v9 = vld [vmem:[#allocation4 + $0x60] sm:$0xff]  ;;  %v672_v10 = vld [vmem:[#allocation4 + $0x58] sm:$0xff] }
  0xcb   :  { %v156_v38 = vsel %vm73_vm15, %v155_v35, %v154_v31  ;;  %v250_v39 = vor.u32 %v249_v37, %v248_v30  ;;  %v253_v40 = vshll.u32 %v252_v36, 23  ;;  %vm270_vm15 = vcmp.lt.s32.totalorder %v269_v63, 2  ;;  %v676_v31 = vld [vmem:[#allocation4 + $0x78] sm:$0xff]  ;;  %v671_v35 = vld [vmem:[#allocation4 + $0x50] sm:$0xff]  ;;  %v670_v30 = vld [vmem:[#allocation4 + $0x48] sm:$0xff] }
  0xcc   :  { %v159_v43 = vsel %vm1095_vm1, %v1037_v13, %v156_v38  ;;  %vm476_vm1 = vcmp.lt.s32.totalorder %v475_v62, 2  ;;  %v905_v13 = vld [vmem:[%s1195_s3 + $0x18] sm:$0xff]   ;;  %846 = vmatpush3.msra.mxu0 %v676_v31  ;;  %v669_v37 = vld [vmem:[#allocation4 + $0x40] sm:$0xff]  ;;  %v667_v38 = vld [vmem:[#allocation4 + $0x30] sm:$0xff] }
  0xcd   :  { %v254_v44 = vor.u32 4788187, %v253_v40  ;;  %v257_v42 = vcvt.s32.f32 %v250_v39  ;;  %908 = vcosq.f32 %v159_v43  ;;  %847 = vmatprep.subr.mxu0 %v970_v29  ;;  %v668_v36 = vld [vmem:[#allocation4 + $0x38] sm:$0xff]  ;;  %v666_v39 = vld [vmem:[#allocation4 + $0x28] sm:$0xff]  ;;  %v665_v40 = vld [vmem:[#allocation4 + $0x20] sm:$0xff] }
  0xce   :  { %910 = vsinq.f32 %v159_v43  ;;  %848 = vmatpush3.msra.mxu0 %v675_v33  ;;  %v496_v63 = vld [vmem:[%s1196_s4 + $0x8] sm:$0xff] }
  0xcf   :  { %v255_v45 = vand.u32 2147483647, %v254_v44  ;;  %849 = vmatprep.subr.mxu0 %v970_v29 }
  0xd0   :  { %850 = vmatpush3.msra.mxu0 %v674_v34 }
  0xd1   :  { %v258_v46 = vmul.f32 %v257_v42, %v255_v45  ;;  %851 = vmatprep.subr.mxu0 %v970_v29 }
  0xd2   :  { %852 = vmatpush3.msra.mxu0 %v673_v9 }
  0xd3   :  { %v259_v48 = vxor.u32 2147483648, %v258_v46  ;;  %853 = vmatprep.subr.mxu0 %v970_v29 }
  0xd4   :  { %854 = vmatpush3.msra.mxu0 %v672_v10 }
  0xd5   :  { %v260_v14 = vsel %vm177_vm2, %v259_v48, %v258_v46  ;;  %vm267_vm2 = vweird.f32 %v1041_v18  ;;  %855 = vmatprep.subr.mxu0 %v970_v29  ;;  %v501_v46 = vld [vmem:[%s1196_s4 + $0x30] sm:$0xff] }
  0xd6   :  { %v263_v52 = vsel %vm176_vm3, %v1041_v18, %v260_v14  ;;  %v904_v18 = vld [vmem:[%s1195_s3 + $0x10] sm:$0xff]   ;;  %vm971_vm3 = vmmov 0   ;;  %856 = vmatpush3.msra.mxu0 %v671_v35 }
  0xd7   :  { %912 = vcosq.f32 %v263_v52  ;;  %877 = vmatprep.mubr.msk.f32.mxu0 %vm971_vm3, %v970_v29  ;;  %857 = vmatprep.subr.mxu0 %v970_v29 }
  0xd8   :  { %914 = vsinq.f32 %v263_v52  ;;  %858 = vmatpush3.msra.mxu0 %v670_v30 }
  0xd9   :  { %859 = vmatprep.subr.mxu0 %v970_v29 }
  0xda   :  { %v909_v56 = vpop.eup %908  ;;  %860 = vmatpush3.msra.mxu0 %v669_v37 }
  0xdb   :  { %v911_v57 = vpop.eup %910  ;;  %v171_v61 = vxor.u32 2147483648, %v909_v56  ;;  %861 = vmatprep.subr.mxu0 %v970_v29 }
  0xdc   :  { %v168_v25 = vxor.u32 2147483648, %v911_v57  ;;  %862 = vmatpush3.msra.mxu0 %v668_v36 }
  0xdd   :  { %v379_v1 = vsel %vm377_vm7, %v171_v61, %v911_v57  ;;  %v172_v6 = vsel %vm170_vm10, %v171_v61, %v911_v57  ;;  %863 = vmatprep.subr.mxu0 %v970_v29 }
  0xde   :  { %v376_v0 = vsel %vm374_vm6, %v909_v56, %v168_v25  ;;  %v169_v5 = vsel %vm167_vm9, %v909_v56, %v168_v25  ;;  %864 = vmatpush3.msra.mxu0 %v667_v38 }
  0xdf   :  { %v380_v11 = vsel %vm373_vm5, %v376_v0, %v379_v1  ;;  %v173_v17 = vsel %vm166_vm8, %v169_v5, %v172_v6  ;;  %865 = vmatprep.subr.mxu0 %v970_v29  ;;  %v495_v1 = vld [vmem:[%s1196_s4] sm:$0xff] }
  0xe0   :  { %v381_v22 = vsel %vm163_vm4, nan, %v380_v11  ;;  %v174_v26 = vsel %vm163_vm4, nan, %v173_v17  ;;  %866 = vmatpush3.msra.mxu0 %v666_v39  ;;  %v663_v17 = vld [vmem:[#allocation4 + $0x10] sm:$0xff] }
  0xe1   :  { %867 = vmatprep.subr.mxu0 %v970_v29 }
  0xe2   :  { %868 = vmatpush3.msra.mxu0 %v665_v40 }
  0xe3   :  { %869 = vmatprep.subr.mxu0 %v970_v29 }
  0xe4   :  { %v913_v51 = vpop.eup %912  ;;  %870 = vmatpush3.msra.mxu0 %v664_v41 }
  0xe5   :  { %v915_v2 = vpop.eup %914  ;;  %v275_v4 = vxor.u32 2147483648, %v913_v51  ;;  %871 = vmatprep.subr.mxu0 %v970_v29 }
  0xe6   :  { %v272_v7 = vxor.u32 2147483648, %v915_v2  ;;  %872 = vmatpush3.msra.mxu0 %v663_v17 }
  0xe7   :  { %v276_v8 = vsel %vm274_vm13, %v275_v4, %v915_v2  ;;  %v482_v12 = vsel %vm480_vm12, %v275_v4, %v915_v2  ;;  %873 = vmatprep.subr.mxu0 %v970_v29 }
  0xe8   :  { %v273_v15 = vsel %vm271_vm14, %v913_v51, %v272_v7  ;;  %v479_v16 = vsel %vm477_vm11, %v913_v51, %v272_v7 }
  0xe9   :  { %v277_v19 = vsel %vm270_vm15, %v273_v15, %v276_v8  ;;  %v483_v20 = vsel %vm476_vm1, %v479_v16, %v482_v12  ;;  %v609_v16 = vld [vmem:[%s1197_s5] sm:$0x1] }
  0xea   :  { %v278_v21 = vsel %vm267_vm2, nan, %v277_v19  ;;  %v484_v23 = vsel %vm267_vm2, nan, %v483_v20  ;;  %v662_v19 = vld [vmem:[#allocation4 + $0x8] sm:$0xff]  ;;  %v661_v20 = vld [vmem:[#allocation4] sm:$0xff] }
  0xeb   :  { %v494_v24 = vpack.c.bf16 %v484_v23, %v381_v22  ;;  %v493_v27 = vpack.c.bf16 %v278_v21, %v174_v26  ;;  %874 = vmatpush3.msra.mxu0 %v662_v19  ;;  %v615_v21 = vstv %s1198_s6  ;;  %s936_s6 = scalar_lea.vmem %s760_s2, 16 }
  0xec   :  { %875 = vmatprep.subr.mxu0 %v970_v29  ;;  %p937_p5 = scmp.ne.s32.totalorder %s760_s2, %s936_s6  ;;  %p942_p7 = scmp.lt.s32.totalorder %s940_s19, %s936_s6 }
  0xed   :  { %821 = vmatprep.subr.bf16.mxu1 %v494_v24  ;;  %876 = vmatpush3.msra.mxu0 %v661_v20 }
  0xee   :  { %822 = vmatpush3.bf16.msra.mxu1 %v494_v24  ;;  %p943_p8 = por %p942_p7, %p941_p6 }
  0xef   :  { %823 = vmatprep.subr.bf16.mxu1 %v493_v27 }
  0xf0   :  { %p944_p9 = pnand %p943_p8, %p937_p5 }
  0xf2   :  { %824 = vmatpush3.bf16.msra.mxu1 %v493_v27 }
  0xf3   :  { %833 = vmatprep.subr.bf16.mxu1 %v970_v29 }
  0xf5   :  { %826 = vmatmul.mubr.msk.bf16.vlgmr.msra.gmra.mxu1 %vm523_vm0, %v903_v28 }
  0xf6   :  { %829 = vmatprep.mubr.msk.bf16.mxu1 %vm523_vm0, %v904_v18 }
  0xfd   :  { %830 = vmatmul.mubr.msk.bf16.gmra.mxu1 %vm523_vm0, %v905_v13  ;;  %vm616_vm0 = vcmask 523264  }
  0xfe   :  { %841 = vmatprep.mubr.msk.bf16.mxu1 %vm971_vm3, %v970_v29 }
 0x1b5   :  { %v827_v43 = vpop.f32.mrf.mxu1 }
 0x1b6   :  { %v579_v51 = vadd.f32 %v827_v43, %v497_v60 }
 0x1b7   :  { %v570_v44 = vpop.f32.mrf.mxu1 }
 0x1b8   :  { %v603_v6 = vmax.f32 %v579_v51, 0.0  ;;  %v571_v7 = vadd.f32 %v570_v44, %v495_v1 }
 0x1b9   :  { %v828_v45 = vpop.f32.mrf.mxu1 }
 0x1ba   :  { %v582_v25 = vadd.f32 %v828_v45, %v498_v55  ;;  %v601_v12 = vmax.f32 %v571_v7, 0.0 }
 0x1bb   :  { %v573_v42 = vpop.f32.mrf.mxu1 }
 0x1bc   :  { %v604_v2 = vmax.f32 %v582_v25, 0.0  ;;  %v574_v4 = vadd.f32 %v573_v42, %v496_v63 }
 0x1bd   :  { %v831_v47 = vpop.f32.mrf.mxu1 }
 0x1be   :  { %v595_v14 = vadd.f32 %v831_v47, %v501_v46  ;;  %v611_v8 = vpack.c.bf16 %v604_v2, %v603_v6  ;;  %v602_v11 = vmax.f32 %v574_v4, 0.0 }
 0x1bf   :  { %v586_v48 = vpop.f32.mrf.mxu1 }
 0x1c0   :  { %v607_v32 = vmax.f32 %v595_v14, 0.0  ;;  %v587_v57 = vadd.f32 %v586_v48, %v499_v50  ;;  %v610_v15 = vpack.c.bf16 %v602_v11, %v601_v12 }
 0x1c1   :  { %v832_v52 = vpop.f32.mrf.mxu1 }
 0x1c2   :  { %v598_v54 = vadd.f32 %v832_v52, %v502_v49  ;;  %v605_v0 = vmax.f32 %v587_v57, 0.0 }
 0x1c3   :  { %v589_v56 = vpop.f32.mrf.mxu1 }
 0x1c4   :  { %v608_v58 = vmax.f32 %v598_v54, 0.0  ;;  %v590_v59 = vadd.f32 %v589_v56, %v500_v53 }
 0x1c6   :  { %v613_v61 = vpack.c.bf16 %v608_v58, %v607_v32  ;;  %v606_v62 = vmax.f32 %v590_v59, 0.0 }
 0x1c8   :  { %834 = vmatpush3.bf16.msra.mxu1 %v613_v61  ;;  %v612_v5 = vpack.c.bf16 %v606_v62, %v605_v0 }
 0x1c9   :  { %835 = vmatprep.subr.bf16.mxu1 %v970_v29 }
 0x1cc   :  { %836 = vmatpush3.bf16.msra.mxu1 %v612_v5 }
 0x1cd   :  { %837 = vmatprep.subr.bf16.mxu1 %v970_v29 }
 0x1d0   :  { %838 = vmatpush3.bf16.msra.mxu1 %v611_v8 }
 0x1d1   :  { %839 = vmatprep.subr.bf16.mxu1 %v970_v29  ;;  %v750_v29 = vstv %s1199_s7 }
 0x1d4   :  { %840 = vmatpush3.bf16.msra.mxu1 %v610_v15 }
 0x1d7   :  { %842 = vmatmul.mubr.msk.bf16.vlgmr.msra.gmra.mxu1 %vm616_vm0, %v609_v16 }
 0x297   :  { %v654_v22 = vpop.f32.mrf.mxu1 }
 0x298   :  { %v655_v23 = vadd.f32 %v654_v22, %v615_v21 }
 0x299   :  { %v843_v24 = vpop.f32.mrf.mxu1 }
 0x29a   :  { %v660_v26 = vmul.f32 %v655_v23, %v1030_v3 }
 0x29b   :  { %v657_v27 = vpop.f32.mrf.mxu1 }
 0x29c   :  { %878 = vmatmul.mubr.f32.vlgmr.msra.gmra.mxu0 %v660_v26 }
 0x29d   :  { %v844_v28 = vpop.f32.mrf.mxu1 }
 0x35c   :  { %v743_v18 = vpop.f32.mrf.mxu0 }
 0x35d   :  { %v747_v13 = vsub.f32 %v655_v23, %v743_v18 }
 0x35e   :  { %v879_v31 = vpop.f32.mrf.mxu0 }
 0x35f   :  { %v748_v33 = vmul.f32 %v747_v13, %v1030_v3 }
 0x361   :  { %v751_v34 = vmul.f32 %v750_v29, %v748_v33 }
 0x363   :  { %752 = vst [vmem:[#allocation7] sm:$0x1] %v751_v34 }
 0x364   :  { %947 = shalt.err (!%p944_p9)
}
 0x365   :  { %762 = dma.vmem_to_hbm [thread:$0]  %s760_s2, 16, %s1200_s8, [#allocation6]  }
 0x366   :  { %958 = dma.done.wait [#allocation6], 16  }
 0x367   :  { %959 = vsyncadd [#allocation6], 4294967280 }
 0x368   :  { %766 = vsyncpa [#allocation5], 1 }
 0x369   :  { %767 = vsyncpa [#allocation6], 1 }

</bundles_post_ra>
